<compile_context>
chip_gen: v7x
topology: tpu7x:2x2x1
jax: 0.10.0
libtpu: 0.0.40
codegen_flags: <defaults>
</compile_context>

<pallas_src>
import functools

import jax
import jax.numpy as jnp
from jax.experimental import pallas as pl
from jax.experimental.pallas import tpu as pltpu


def _round_up(a, b):
    return (a + b - 1) // b * b


def _lightsbm_kernel(p_ref, x_ref, g_ref, z_ref, o_ref, *, K, D):
    """Processes one batch tile laid out lane-dense.

    p_ref : SMEM f32[5*K*D + K]  packed per-component scalars:
              [0*K*D:]  coefA[k,d] = S[k,d] / (2*eps)
              [1*K*D:]  coefB[k,d] = r[k,d] / eps
              [2*K*D:]  S[k,d]     = exp(S_log_diag[k,d])
              [3*K*D:]  r[k,d]
              [4*K*D:]  ses[k,d]   = sqrt(eps * S[k,d])
              [5*K*D:]  log_alpha[k]
    x_ref : VMEM f32[D, TS, 128]  input          (samples on sublanes x lanes)
    g_ref : VMEM f32[K, TS, 128]  Gumbel(0,1) noise
    z_ref : VMEM f32[D, TS, 128]  N(0,1) noise
    o_ref : VMEM f32[D, TS, 128]  output sample
    """
    KD = K * D
    OFF_A, OFF_B, OFF_S, OFF_R, OFF_SES, OFF_LA = (
        0, KD, 2 * KD, 3 * KD, 4 * KD, 5 * KD)

    xs = [x_ref[d] for d in range(D)]          # each (TS, 128), full vregs
    x2 = [xd * xd for xd in xs]
    zs = [z_ref[d] for d in range(D)]

    def perturbed_logit(k):
        # logits_k + gumbel_k, with eps folded into the scalar coefficients.
        acc = g_ref[k] + p_ref[OFF_LA + k]
        for d in range(D):
            acc = acc + p_ref[OFF_A + k * D + d] * x2[d] \
                      + p_ref[OFF_B + k * D + d] * xs[d]
        return acc

    def candidate(k, d):
        # Sample of component k along dim d: r + S*x + sqrt(eps*S)*z.
        return (p_ref[OFF_R + k * D + d]
                + p_ref[OFF_S + k * D + d] * xs[d]
                + p_ref[OFF_SES + k * D + d] * zs[d])

    # Gumbel-max over K components with a running strict-max (ties -> first
    # index, matching argmax), selecting the winning sample on the fly.
    best = perturbed_logit(0)
    sel = [candidate(0, d) for d in range(D)]
    for k in range(1, K):
        pk = perturbed_logit(k)
        take = pk > best
        best = jnp.where(take, pk, best)
        for d in range(D):
            sel[d] = jnp.where(take, candidate(k, d), sel[d])

    for d in range(D):
        o_ref[d] = sel[d]


def lightsbm_forward(x, *, s_log_diag, r, log_alpha, epsilon,
                     gumbel, normal, block_rows=256):
    """LightSBM.forward (is_diagonal=True) on TPU.

    x:(B,D) gumbel:(B,K) normal:(B,D).  `block_rows` = sublane rows of 128
    samples per grid step (sweep knob; rounded to a multiple of 8).
    """
    B, D = x.shape
    K = r.shape[0]
    f32 = jnp.float32
    x = x.astype(f32)
    gumbel = gumbel.astype(f32)
    normal = normal.astype(f32)
    eps = jnp.asarray(epsilon, f32)

    # ---- hoisted parameter preprocessing (K*D elements, done once) ----
    S = jnp.exp(s_log_diag.astype(f32))                          # (K, D)
    ses = jnp.sqrt(eps) * jnp.exp(0.5 * s_log_diag.astype(f32))  # sqrt(eps*S)
    inv_2eps = 1.0 / (2.0 * eps)
    params = jnp.concatenate([
        (S * inv_2eps).reshape(-1),                       # coefA = S/(2*eps)
        (r.astype(f32) * (2.0 * inv_2eps)).reshape(-1),   # coefB = r/eps
        S.reshape(-1),
        r.astype(f32).reshape(-1),
        ses.reshape(-1),
        log_alpha.astype(f32).reshape(-1),
    ]).astype(f32)
    P = int(params.shape[0])

    # ---- batch tiling: lane-dense layout (rows of 128 samples) ----
    # Keep double-buffered VMEM well under the scoped limit: per tile we hold
    # (3D + K) input planes + D output planes of (TS, 128) f32, x2 buffers.
    planes = 3 * D + K + D
    vmem_budget = 24 << 20
    max_rows = max(8, (vmem_budget // (2 * planes * 128 * 4)) // 8 * 8)
    block_rows = max(8, min(_round_up(block_rows, 8), max_rows))

    r_min = _round_up(B, 128) // 128             # rows needed for the batch
    if r_min <= block_rows:
        TS, R = r_min, r_min                     # single grid step
    else:
        TS = block_rows
        R = _round_up(r_min, TS)
    Bp = R * 128
    pad = Bp - B
    if pad:
        x = jnp.pad(x, ((0, pad), (0, 0)))
        gumbel = jnp.pad(gumbel, ((0, pad), (0, 0)))
        normal = jnp.pad(normal, ((0, pad), (0, 0)))

    xT = x.T.reshape(D, R, 128)                  # (D, R, 128)
    gT = gumbel.T.reshape(K, R, 128)             # (K, R, 128)
    zT = normal.T.reshape(D, R, 128)             # (D, R, 128)

    grid = (R // TS,)
    tile = lambda rows: pl.BlockSpec((rows, TS, 128), lambda i: (0, i, 0))

    cost = pl.CostEstimate(
        flops=int(Bp) * (D + K * (1 + 4 * D) + K * D * 4 + (K - 1) * (2 + D)),
        transcendentals=0,
        bytes_accessed=4 * int(Bp) * (3 * D + K + D) + 4 * P,
    )

    out_t = pl.pallas_call(
        functools.partial(_lightsbm_kernel, K=K, D=D),
        out_shape=jax.ShapeDtypeStruct((D, R, 128), f32),
        grid=grid,
        in_specs=[
            pl.BlockSpec((P,), lambda i: (0,),
                         memory_space=pltpu.MemorySpace.SMEM),
            tile(D),   # x
            tile(K),   # gumbel
            tile(D),   # normal
        ],
        out_specs=tile(D),
        compiler_params=pltpu.CompilerParams(
            dimension_semantics=("parallel",),
            vmem_limit_bytes=64 << 20),
        cost_estimate=cost,
    )(params, xT, gT, zT)

    # back to (B, D)
    return out_t.reshape(D, Bp).T[:B]


def _reference_forward(x, s_log_diag, r, log_alpha, epsilon, gumbel, normal):
    """Pure-JAX replica of the same math (same noise) for a sanity check."""
    S = jnp.exp(s_log_diag)
    x_S_x = jnp.einsum("bd,kd->bk", x * x, S)
    x_r = jnp.einsum("bd,kd->bk", x, r)
    logits = (x_S_x + 2.0 * x_r) / (2.0 * epsilon) + log_alpha[None, :]
    k = jnp.argmax(logits + gumbel, axis=-1)
    S_sel = S[k]
    r_sel = r[k]
    return r_sel + S_sel * x + jnp.sqrt(epsilon * S_sel) * normal


if __name__ == "__main__":
    # Module hyperparameters (defaults from LightSBM.__init__).
    dim = 2
    n_potentials = 5
    epsilon = 1.0
    S_diagonal_init = 0.1
    batch = 2500            # small (20 KB of f32) but exercises grid + padding

    key = jax.random.PRNGKey(0)
    k_r, k_x, k_gumbel, k_normal = jax.random.split(key, 4)

    # Deterministic parameter initialization (mirrors nn.Parameter shapes).
    log_alpha = jnp.log(jnp.ones((n_potentials,), jnp.float32) / n_potentials)
    r = jax.random.normal(k_r, (n_potentials, dim), jnp.float32)
    s_log_diag = jnp.log(S_diagonal_init *
                         jnp.ones((n_potentials, dim), jnp.float32))
    # r_scale and S_rotation_matrix are unused in the diagonal forward pass.

    # Inputs and deterministic sampling noise.
    x = jax.random.normal(k_x, (batch, dim), jnp.float32)
    gumbel = jax.random.gumbel(k_gumbel, (batch, n_potentials), jnp.float32)
    normal = jax.random.normal(k_normal, (batch, dim), jnp.float32)

    # Multi-step grid path (small tile) — checks tiling/padding correctness.
    out_small = lightsbm_forward(
        x, s_log_diag=s_log_diag, r=r, log_alpha=log_alpha, epsilon=epsilon,
        gumbel=gumbel, normal=normal, block_rows=8)
    out_small = jax.block_until_ready(out_small)

    # Default (single-step, large-tile) path.
    out = lightsbm_forward(
        x, s_log_diag=s_log_diag, r=r, log_alpha=log_alpha, epsilon=epsilon,
        gumbel=gumbel, normal=normal)
    out = jax.block_until_ready(out)

    ref = _reference_forward(x, s_log_diag, r, log_alpha, epsilon, gumbel,
                             normal)
    assert out.shape == (batch, dim)
    assert bool(jnp.allclose(out, ref, atol=1e-5, rtol=1e-5)), "mismatch vs ref"
    assert bool(jnp.allclose(out_small, ref, atol=1e-5, rtol=1e-5)), \
        "mismatch vs ref (tiled path)"
    print("KERNEL_OK")
</pallas_src>

<mosaic_0001>
module attributes {stable_mosaic.version = 11 : i64} {
  func.func @_lightsbm_kernel(%arg0: i32, %arg1: memref<55xf32, #tpu.memory_space<smem>>, %arg2: memref<2x8x128xf32, #tpu.memory_space<vmem>>, %arg3: memref<5x8x128xf32, #tpu.memory_space<vmem>>, %arg4: memref<2x8x128xf32, #tpu.memory_space<vmem>>, %arg5: memref<2x8x128xf32, #tpu.memory_space<vmem>>) attributes {dimension_semantics = [#tpu.dimension_semantics<parallel>], iteration_bounds = array<i64: 3>, scalar_prefetch = 0 : i64, scratch_operands = 0 : i64, tpu.core_type = #tpu.core_type<tc>, window_params = [{transform_indices = @transform_0, window_bounds = array<i64: 55>}, {transform_indices = @transform_1, window_bounds = array<i64: 2, 8, 128>}, {transform_indices = @transform_2, window_bounds = array<i64: 5, 8, 128>}, {transform_indices = @transform_3, window_bounds = array<i64: 2, 8, 128>}, {transform_indices = @transform_4, window_bounds = array<i64: 2, 8, 128>}]} {
    %c0 = arith.constant 0 : index
    %c0_0 = arith.constant 0 : index
    %c0_1 = arith.constant 0 : index
    %0 = vector.load %arg2[%c0, %c0_0, %c0_1] : memref<2x8x128xf32, #tpu.memory_space<vmem>>, vector<1x8x128xf32>
    %1 = vector.shape_cast %0 : vector<1x8x128xf32> to vector<8x128xf32>
    %c1 = arith.constant 1 : index
    %c0_2 = arith.constant 0 : index
    %c0_3 = arith.constant 0 : index
    %2 = vector.load %arg2[%c1, %c0_2, %c0_3] : memref<2x8x128xf32, #tpu.memory_space<vmem>>, vector<1x8x128xf32>
    %3 = vector.shape_cast %2 : vector<1x8x128xf32> to vector<8x128xf32>
    %4 = arith.mulf %1, %1 : vector<8x128xf32>
    %5 = arith.mulf %3, %3 : vector<8x128xf32>
    %c0_4 = arith.constant 0 : index
    %c0_5 = arith.constant 0 : index
    %c0_6 = arith.constant 0 : index
    %6 = vector.load %arg4[%c0_4, %c0_5, %c0_6] : memref<2x8x128xf32, #tpu.memory_space<vmem>>, vector<1x8x128xf32>
    %7 = vector.shape_cast %6 : vector<1x8x128xf32> to vector<8x128xf32>
    %c1_7 = arith.constant 1 : index
    %c0_8 = arith.constant 0 : index
    %c0_9 = arith.constant 0 : index
    %8 = vector.load %arg4[%c1_7, %c0_8, %c0_9] : memref<2x8x128xf32, #tpu.memory_space<vmem>>, vector<1x8x128xf32>
    %9 = vector.shape_cast %8 : vector<1x8x128xf32> to vector<8x128xf32>
    %c0_10 = arith.constant 0 : index
    %c0_11 = arith.constant 0 : index
    %c0_12 = arith.constant 0 : index
    %10 = vector.load %arg3[%c0_10, %c0_11, %c0_12] : memref<5x8x128xf32, #tpu.memory_space<vmem>>, vector<1x8x128xf32>
    %11 = vector.shape_cast %10 : vector<1x8x128xf32> to vector<8x128xf32>
    %c50 = arith.constant 50 : index
    %12 = memref.load %arg1[%c50] : memref<55xf32, #tpu.memory_space<smem>>
    %13 = vector.broadcast %12 : f32 to vector<8x128xf32>
    %14 = arith.addf %11, %13 : vector<8x128xf32>
    %c0_13 = arith.constant 0 : index
    %15 = memref.load %arg1[%c0_13] : memref<55xf32, #tpu.memory_space<smem>>
    %16 = vector.broadcast %15 : f32 to vector<8x128xf32>
    %17 = arith.mulf %16, %4 : vector<8x128xf32>
    %18 = arith.addf %14, %17 : vector<8x128xf32>
    %c10 = arith.constant 10 : index
    %19 = memref.load %arg1[%c10] : memref<55xf32, #tpu.memory_space<smem>>
    %20 = vector.broadcast %19 : f32 to vector<8x128xf32>
    %21 = arith.mulf %20, %1 : vector<8x128xf32>
    %22 = arith.addf %18, %21 : vector<8x128xf32>
    %c1_14 = arith.constant 1 : index
    %23 = memref.load %arg1[%c1_14] : memref<55xf32, #tpu.memory_space<smem>>
    %24 = vector.broadcast %23 : f32 to vector<8x128xf32>
    %25 = arith.mulf %24, %5 : vector<8x128xf32>
    %26 = arith.addf %22, %25 : vector<8x128xf32>
    %c11 = arith.constant 11 : index
    %27 = memref.load %arg1[%c11] : memref<55xf32, #tpu.memory_space<smem>>
    %28 = vector.broadcast %27 : f32 to vector<8x128xf32>
    %29 = arith.mulf %28, %3 : vector<8x128xf32>
    %30 = arith.addf %26, %29 : vector<8x128xf32>
    %c30 = arith.constant 30 : index
    %31 = memref.load %arg1[%c30] : memref<55xf32, #tpu.memory_space<smem>>
    %c20 = arith.constant 20 : index
    %32 = memref.load %arg1[%c20] : memref<55xf32, #tpu.memory_space<smem>>
    %33 = vector.broadcast %32 : f32 to vector<8x128xf32>
    %34 = arith.mulf %33, %1 : vector<8x128xf32>
    %35 = vector.broadcast %31 : f32 to vector<8x128xf32>
    %36 = arith.addf %35, %34 : vector<8x128xf32>
    %c40 = arith.constant 40 : index
    %37 = memref.load %arg1[%c40] : memref<55xf32, #tpu.memory_space<smem>>
    %38 = vector.broadcast %37 : f32 to vector<8x128xf32>
    %39 = arith.mulf %38, %7 : vector<8x128xf32>
    %40 = arith.addf %36, %39 : vector<8x128xf32>
    %c31 = arith.constant 31 : index
    %41 = memref.load %arg1[%c31] : memref<55xf32, #tpu.memory_space<smem>>
    %c21 = arith.constant 21 : index
    %42 = memref.load %arg1[%c21] : memref<55xf32, #tpu.memory_space<smem>>
    %43 = vector.broadcast %42 : f32 to vector<8x128xf32>
    %44 = arith.mulf %43, %3 : vector<8x128xf32>
    %45 = vector.broadcast %41 : f32 to vector<8x128xf32>
    %46 = arith.addf %45, %44 : vector<8x128xf32>
    %c41 = arith.constant 41 : index
    %47 = memref.load %arg1[%c41] : memref<55xf32, #tpu.memory_space<smem>>
    %48 = vector.broadcast %47 : f32 to vector<8x128xf32>
    %49 = arith.mulf %48, %9 : vector<8x128xf32>
    %50 = arith.addf %46, %49 : vector<8x128xf32>
    %c1_15 = arith.constant 1 : index
    %c0_16 = arith.constant 0 : index
    %c0_17 = arith.constant 0 : index
    %51 = vector.load %arg3[%c1_15, %c0_16, %c0_17] : memref<5x8x128xf32, #tpu.memory_space<vmem>>, vector<1x8x128xf32>
    %52 = vector.shape_cast %51 : vector<1x8x128xf32> to vector<8x128xf32>
    %c51 = arith.constant 51 : index
    %53 = memref.load %arg1[%c51] : memref<55xf32, #tpu.memory_space<smem>>
    %54 = vector.broadcast %53 : f32 to vector<8x128xf32>
    %55 = arith.addf %52, %54 : vector<8x128xf32>
    %c2 = arith.constant 2 : index
    %56 = memref.load %arg1[%c2] : memref<55xf32, #tpu.memory_space<smem>>
    %57 = vector.broadcast %56 : f32 to vector<8x128xf32>
    %58 = arith.mulf %57, %4 : vector<8x128xf32>
    %59 = arith.addf %55, %58 : vector<8x128xf32>
    %c12 = arith.constant 12 : index
    %60 = memref.load %arg1[%c12] : memref<55xf32, #tpu.memory_space<smem>>
    %61 = vector.broadcast %60 : f32 to vector<8x128xf32>
    %62 = arith.mulf %61, %1 : vector<8x128xf32>
    %63 = arith.addf %59, %62 : vector<8x128xf32>
    %c3 = arith.constant 3 : index
    %64 = memref.load %arg1[%c3] : memref<55xf32, #tpu.memory_space<smem>>
    %65 = vector.broadcast %64 : f32 to vector<8x128xf32>
    %66 = arith.mulf %65, %5 : vector<8x128xf32>
    %67 = arith.addf %63, %66 : vector<8x128xf32>
    %c13 = arith.constant 13 : index
    %68 = memref.load %arg1[%c13] : memref<55xf32, #tpu.memory_space<smem>>
    %69 = vector.broadcast %68 : f32 to vector<8x128xf32>
    %70 = arith.mulf %69, %3 : vector<8x128xf32>
    %71 = arith.addf %67, %70 : vector<8x128xf32>
    %72 = arith.cmpf ogt, %71, %30 : vector<8x128xf32>
    %73 = arith.select %72, %71, %30 : vector<8x128xi1>, vector<8x128xf32>
    %c32 = arith.constant 32 : index
    %74 = memref.load %arg1[%c32] : memref<55xf32, #tpu.memory_space<smem>>
    %c22 = arith.constant 22 : index
    %75 = memref.load %arg1[%c22] : memref<55xf32, #tpu.memory_space<smem>>
    %76 = vector.broadcast %75 : f32 to vector<8x128xf32>
    %77 = arith.mulf %76, %1 : vector<8x128xf32>
    %78 = vector.broadcast %74 : f32 to vector<8x128xf32>
    %79 = arith.addf %78, %77 : vector<8x128xf32>
    %c42 = arith.constant 42 : index
    %80 = memref.load %arg1[%c42] : memref<55xf32, #tpu.memory_space<smem>>
    %81 = vector.broadcast %80 : f32 to vector<8x128xf32>
    %82 = arith.mulf %81, %7 : vector<8x128xf32>
    %83 = arith.addf %79, %82 : vector<8x128xf32>
    %84 = arith.select %72, %83, %40 : vector<8x128xi1>, vector<8x128xf32>
    %c33 = arith.constant 33 : index
    %85 = memref.load %arg1[%c33] : memref<55xf32, #tpu.memory_space<smem>>
    %c23 = arith.constant 23 : index
    %86 = memref.load %arg1[%c23] : memref<55xf32, #tpu.memory_space<smem>>
    %87 = vector.broadcast %86 : f32 to vector<8x128xf32>
    %88 = arith.mulf %87, %3 : vector<8x128xf32>
    %89 = vector.broadcast %85 : f32 to vector<8x128xf32>
    %90 = arith.addf %89, %88 : vector<8x128xf32>
    %c43 = arith.constant 43 : index
    %91 = memref.load %arg1[%c43] : memref<55xf32, #tpu.memory_space<smem>>
    %92 = vector.broadcast %91 : f32 to vector<8x128xf32>
    %93 = arith.mulf %92, %9 : vector<8x128xf32>
    %94 = arith.addf %90, %93 : vector<8x128xf32>
    %95 = arith.select %72, %94, %50 : vector<8x128xi1>, vector<8x128xf32>
    %c2_18 = arith.constant 2 : index
    %c0_19 = arith.constant 0 : index
    %c0_20 = arith.constant 0 : index
    %96 = vector.load %arg3[%c2_18, %c0_19, %c0_20] : memref<5x8x128xf32, #tpu.memory_space<vmem>>, vector<1x8x128xf32>
    %97 = vector.shape_cast %96 : vector<1x8x128xf32> to vector<8x128xf32>
    %c52 = arith.constant 52 : index
    %98 = memref.load %arg1[%c52] : memref<55xf32, #tpu.memory_space<smem>>
    %99 = vector.broadcast %98 : f32 to vector<8x128xf32>
    %100 = arith.addf %97, %99 : vector<8x128xf32>
    %c4 = arith.constant 4 : index
    %101 = memref.load %arg1[%c4] : memref<55xf32, #tpu.memory_space<smem>>
    %102 = vector.broadcast %101 : f32 to vector<8x128xf32>
    %103 = arith.mulf %102, %4 : vector<8x128xf32>
    %104 = arith.addf %100, %103 : vector<8x128xf32>
    %c14 = arith.constant 14 : index
    %105 = memref.load %arg1[%c14] : memref<55xf32, #tpu.memory_space<smem>>
    %106 = vector.broadcast %105 : f32 to vector<8x128xf32>
    %107 = arith.mulf %106, %1 : vector<8x128xf32>
    %108 = arith.addf %104, %107 : vector<8x128xf32>
    %c5 = arith.constant 5 : index
    %109 = memref.load %arg1[%c5] : memref<55xf32, #tpu.memory_space<smem>>
    %110 = vector.broadcast %109 : f32 to vector<8x128xf32>
    %111 = arith.mulf %110, %5 : vector<8x128xf32>
    %112 = arith.addf %108, %111 : vector<8x128xf32>
    %c15 = arith.constant 15 : index
    %113 = memref.load %arg1[%c15] : memref<55xf32, #tpu.memory_space<smem>>
    %114 = vector.broadcast %113 : f32 to vector<8x128xf32>
    %115 = arith.mulf %114, %3 : vector<8x128xf32>
    %116 = arith.addf %112, %115 : vector<8x128xf32>
    %117 = arith.cmpf ogt, %116, %73 : vector<8x128xf32>
    %118 = arith.select %117, %116, %73 : vector<8x128xi1>, vector<8x128xf32>
    %c34 = arith.constant 34 : index
    %119 = memref.load %arg1[%c34] : memref<55xf32, #tpu.memory_space<smem>>
    %c24 = arith.constant 24 : index
    %120 = memref.load %arg1[%c24] : memref<55xf32, #tpu.memory_space<smem>>
    %121 = vector.broadcast %120 : f32 to vector<8x128xf32>
    %122 = arith.mulf %121, %1 : vector<8x128xf32>
    %123 = vector.broadcast %119 : f32 to vector<8x128xf32>
    %124 = arith.addf %123, %122 : vector<8x128xf32>
    %c44 = arith.constant 44 : index
    %125 = memref.load %arg1[%c44] : memref<55xf32, #tpu.memory_space<smem>>
    %126 = vector.broadcast %125 : f32 to vector<8x128xf32>
    %127 = arith.mulf %126, %7 : vector<8x128xf32>
    %128 = arith.addf %124, %127 : vector<8x128xf32>
    %129 = arith.select %117, %128, %84 : vector<8x128xi1>, vector<8x128xf32>
    %c35 = arith.constant 35 : index
    %130 = memref.load %arg1[%c35] : memref<55xf32, #tpu.memory_space<smem>>
    %c25 = arith.constant 25 : index
    %131 = memref.load %arg1[%c25] : memref<55xf32, #tpu.memory_space<smem>>
    %132 = vector.broadcast %131 : f32 to vector<8x128xf32>
    %133 = arith.mulf %132, %3 : vector<8x128xf32>
    %134 = vector.broadcast %130 : f32 to vector<8x128xf32>
    %135 = arith.addf %134, %133 : vector<8x128xf32>
    %c45 = arith.constant 45 : index
    %136 = memref.load %arg1[%c45] : memref<55xf32, #tpu.memory_space<smem>>
    %137 = vector.broadcast %136 : f32 to vector<8x128xf32>
    %138 = arith.mulf %137, %9 : vector<8x128xf32>
    %139 = arith.addf %135, %138 : vector<8x128xf32>
    %140 = arith.select %117, %139, %95 : vector<8x128xi1>, vector<8x128xf32>
    %c3_21 = arith.constant 3 : index
    %c0_22 = arith.constant 0 : index
    %c0_23 = arith.constant 0 : index
    %141 = vector.load %arg3[%c3_21, %c0_22, %c0_23] : memref<5x8x128xf32, #tpu.memory_space<vmem>>, vector<1x8x128xf32>
    %142 = vector.shape_cast %141 : vector<1x8x128xf32> to vector<8x128xf32>
    %c53 = arith.constant 53 : index
    %143 = memref.load %arg1[%c53] : memref<55xf32, #tpu.memory_space<smem>>
    %144 = vector.broadcast %143 : f32 to vector<8x128xf32>
    %145 = arith.addf %142, %144 : vector<8x128xf32>
    %c6 = arith.constant 6 : index
    %146 = memref.load %arg1[%c6] : memref<55xf32, #tpu.memory_space<smem>>
    %147 = vector.broadcast %146 : f32 to vector<8x128xf32>
    %148 = arith.mulf %147, %4 : vector<8x128xf32>
    %149 = arith.addf %145, %148 : vector<8x128xf32>
    %c16 = arith.constant 16 : index
    %150 = memref.load %arg1[%c16] : memref<55xf32, #tpu.memory_space<smem>>
    %151 = vector.broadcast %150 : f32 to vector<8x128xf32>
    %152 = arith.mulf %151, %1 : vector<8x128xf32>
    %153 = arith.addf %149, %152 : vector<8x128xf32>
    %c7 = arith.constant 7 : index
    %154 = memref.load %arg1[%c7] : memref<55xf32, #tpu.memory_space<smem>>
    %155 = vector.broadcast %154 : f32 to vector<8x128xf32>
    %156 = arith.mulf %155, %5 : vector<8x128xf32>
    %157 = arith.addf %153, %156 : vector<8x128xf32>
    %c17 = arith.constant 17 : index
    %158 = memref.load %arg1[%c17] : memref<55xf32, #tpu.memory_space<smem>>
    %159 = vector.broadcast %158 : f32 to vector<8x128xf32>
    %160 = arith.mulf %159, %3 : vector<8x128xf32>
    %161 = arith.addf %157, %160 : vector<8x128xf32>
    %162 = arith.cmpf ogt, %161, %118 : vector<8x128xf32>
    %163 = arith.select %162, %161, %118 : vector<8x128xi1>, vector<8x128xf32>
    %c36 = arith.constant 36 : index
    %164 = memref.load %arg1[%c36] : memref<55xf32, #tpu.memory_space<smem>>
    %c26 = arith.constant 26 : index
    %165 = memref.load %arg1[%c26] : memref<55xf32, #tpu.memory_space<smem>>
    %166 = vector.broadcast %165 : f32 to vector<8x128xf32>
    %167 = arith.mulf %166, %1 : vector<8x128xf32>
    %168 = vector.broadcast %164 : f32 to vector<8x128xf32>
    %169 = arith.addf %168, %167 : vector<8x128xf32>
    %c46 = arith.constant 46 : index
    %170 = memref.load %arg1[%c46] : memref<55xf32, #tpu.memory_space<smem>>
    %171 = vector.broadcast %170 : f32 to vector<8x128xf32>
    %172 = arith.mulf %171, %7 : vector<8x128xf32>
    %173 = arith.addf %169, %172 : vector<8x128xf32>
    %174 = arith.select %162, %173, %129 : vector<8x128xi1>, vector<8x128xf32>
    %c37 = arith.constant 37 : index
    %175 = memref.load %arg1[%c37] : memref<55xf32, #tpu.memory_space<smem>>
    %c27 = arith.constant 27 : index
    %176 = memref.load %arg1[%c27] : memref<55xf32, #tpu.memory_space<smem>>
    %177 = vector.broadcast %176 : f32 to vector<8x128xf32>
    %178 = arith.mulf %177, %3 : vector<8x128xf32>
    %179 = vector.broadcast %175 : f32 to vector<8x128xf32>
    %180 = arith.addf %179, %178 : vector<8x128xf32>
    %c47 = arith.constant 47 : index
    %181 = memref.load %arg1[%c47] : memref<55xf32, #tpu.memory_space<smem>>
    %182 = vector.broadcast %181 : f32 to vector<8x128xf32>
    %183 = arith.mulf %182, %9 : vector<8x128xf32>
    %184 = arith.addf %180, %183 : vector<8x128xf32>
    %185 = arith.select %162, %184, %140 : vector<8x128xi1>, vector<8x128xf32>
    %c4_24 = arith.constant 4 : index
    %c0_25 = arith.constant 0 : index
    %c0_26 = arith.constant 0 : index
    %186 = vector.load %arg3[%c4_24, %c0_25, %c0_26] : memref<5x8x128xf32, #tpu.memory_space<vmem>>, vector<1x8x128xf32>
    %187 = vector.shape_cast %186 : vector<1x8x128xf32> to vector<8x128xf32>
    %c54 = arith.constant 54 : index
    %188 = memref.load %arg1[%c54] : memref<55xf32, #tpu.memory_space<smem>>
    %189 = vector.broadcast %188 : f32 to vector<8x128xf32>
    %190 = arith.addf %187, %189 : vector<8x128xf32>
    %c8 = arith.constant 8 : index
    %191 = memref.load %arg1[%c8] : memref<55xf32, #tpu.memory_space<smem>>
    %192 = vector.broadcast %191 : f32 to vector<8x128xf32>
    %193 = arith.mulf %192, %4 : vector<8x128xf32>
    %194 = arith.addf %190, %193 : vector<8x128xf32>
    %c18 = arith.constant 18 : index
    %195 = memref.load %arg1[%c18] : memref<55xf32, #tpu.memory_space<smem>>
    %196 = vector.broadcast %195 : f32 to vector<8x128xf32>
    %197 = arith.mulf %196, %1 : vector<8x128xf32>
    %198 = arith.addf %194, %197 : vector<8x128xf32>
    %c9 = arith.constant 9 : index
    %199 = memref.load %arg1[%c9] : memref<55xf32, #tpu.memory_space<smem>>
    %200 = vector.broadcast %199 : f32 to vector<8x128xf32>
    %201 = arith.mulf %200, %5 : vector<8x128xf32>
    %202 = arith.addf %198, %201 : vector<8x128xf32>
    %c19 = arith.constant 19 : index
    %203 = memref.load %arg1[%c19] : memref<55xf32, #tpu.memory_space<smem>>
    %204 = vector.broadcast %203 : f32 to vector<8x128xf32>
    %205 = arith.mulf %204, %3 : vector<8x128xf32>
    %206 = arith.addf %202, %205 : vector<8x128xf32>
    %207 = arith.cmpf ogt, %206, %163 : vector<8x128xf32>
    %c38 = arith.constant 38 : index
    %208 = memref.load %arg1[%c38] : memref<55xf32, #tpu.memory_space<smem>>
    %c28 = arith.constant 28 : index
    %209 = memref.load %arg1[%c28] : memref<55xf32, #tpu.memory_space<smem>>
    %210 = vector.broadcast %209 : f32 to vector<8x128xf32>
    %211 = arith.mulf %210, %1 : vector<8x128xf32>
    %212 = vector.broadcast %208 : f32 to vector<8x128xf32>
    %213 = arith.addf %212, %211 : vector<8x128xf32>
    %c48 = arith.constant 48 : index
    %214 = memref.load %arg1[%c48] : memref<55xf32, #tpu.memory_space<smem>>
    %215 = vector.broadcast %214 : f32 to vector<8x128xf32>
    %216 = arith.mulf %215, %7 : vector<8x128xf32>
    %217 = arith.addf %213, %216 : vector<8x128xf32>
    %218 = arith.select %207, %217, %174 : vector<8x128xi1>, vector<8x128xf32>
    %c39 = arith.constant 39 : index
    %219 = memref.load %arg1[%c39] : memref<55xf32, #tpu.memory_space<smem>>
    %c29 = arith.constant 29 : index
    %220 = memref.load %arg1[%c29] : memref<55xf32, #tpu.memory_space<smem>>
    %221 = vector.broadcast %220 : f32 to vector<8x128xf32>
    %222 = arith.mulf %221, %3 : vector<8x128xf32>
    %223 = vector.broadcast %219 : f32 to vector<8x128xf32>
    %224 = arith.addf %223, %222 : vector<8x128xf32>
    %c49 = arith.constant 49 : index
    %225 = memref.load %arg1[%c49] : memref<55xf32, #tpu.memory_space<smem>>
    %226 = vector.broadcast %225 : f32 to vector<8x128xf32>
    %227 = arith.mulf %226, %9 : vector<8x128xf32>
    %228 = arith.addf %224, %227 : vector<8x128xf32>
    %229 = arith.select %207, %228, %185 : vector<8x128xi1>, vector<8x128xf32>
    %c0_27 = arith.constant 0 : index
    %c0_28 = arith.constant 0 : index
    %c0_29 = arith.constant 0 : index
    %230 = vector.load %arg5[%c0_27, %c0_28, %c0_29] : memref<2x8x128xf32, #tpu.memory_space<vmem>>, vector<1x8x128xf32>
    %231 = vector.shape_cast %230 : vector<1x8x128xf32> to vector<8x128xf32>
    %232 = vector.shape_cast %218 : vector<8x128xf32> to vector<1x8x128xf32>
    tpu.vector_store %arg5[%c0_27, %c0_28, %c0_29], %232 {strides = array<i32>} : memref<2x8x128xf32, #tpu.memory_space<vmem>>, vector<1x8x128xf32>,
    %c1_30 = arith.constant 1 : index
    %c0_31 = arith.constant 0 : index
    %c0_32 = arith.constant 0 : index
    %233 = vector.load %arg5[%c1_30, %c0_31, %c0_32] : memref<2x8x128xf32, #tpu.memory_space<vmem>>, vector<1x8x128xf32>
    %234 = vector.shape_cast %233 : vector<1x8x128xf32> to vector<8x128xf32>
    %235 = vector.shape_cast %229 : vector<8x128xf32> to vector<1x8x128xf32>
    tpu.vector_store %arg5[%c1_30, %c0_31, %c0_32], %235 {strides = array<i32>} : memref<2x8x128xf32, #tpu.memory_space<vmem>>, vector<1x8x128xf32>,
    return
  }
  func.func @transform_0(%arg0: i32) -> i32 {
    %c0_i32 = arith.constant 0 : i32
    %c0_i32_0 = arith.constant 0 : i32
    return %c0_i32 : i32
  }
  func.func @transform_1(%arg0: i32) -> (i32, i32, i32) {
    %c0_i32 = arith.constant 0 : i32
    %c0_i32_0 = arith.constant 0 : i32
    %c0_i32_1 = arith.constant 0 : i32
    return %c0_i32, %arg0, %c0_i32_0 : i32, i32, i32
  }
  func.func @transform_2(%arg0: i32) -> (i32, i32, i32) {
    %c0_i32 = arith.constant 0 : i32
    %c0_i32_0 = arith.constant 0 : i32
    %c0_i32_1 = arith.constant 0 : i32
    return %c0_i32, %arg0, %c0_i32_0 : i32, i32, i32
  }
  func.func @transform_3(%arg0: i32) -> (i32, i32, i32) {
    %c0_i32 = arith.constant 0 : i32
    %c0_i32_0 = arith.constant 0 : i32
    %c0_i32_1 = arith.constant 0 : i32
    return %c0_i32, %arg0, %c0_i32_0 : i32, i32, i32
  }
  func.func @transform_4(%arg0: i32) -> (i32, i32, i32) {
    %c0_i32 = arith.constant 0 : i32
    %c0_i32_0 = arith.constant 0 : i32
    %c0_i32_1 = arith.constant 0 : i32
    return %c0_i32, %arg0, %c0_i32_0 : i32, i32, i32
  }
}

</mosaic_0001>

<bundles_post_ra>
// kernel: tpu_custom_call.1
= control target key start
LH: loop header
LB: loop body
LE: loop exit
PB: predicated region body
PF: predicated region fallthrough
CT: control target
= control target key end

     0   :  { %s1588_s0 = inlined_call_operand.hbm [shape: f32[55], index: 0, kind: input, shape index: {}]   ;;  %s1589_s1 = inlined_call_operand.hbm [shape: f32[2,24,128], index: 1, kind: input, shape index: {}]   ;;  %s1590_s2 = inlined_call_operand.hbm [shape: f32[5,24,128], index: 2, kind: input, shape index: {}]   ;;  %s1591_s3 = inlined_call_operand.hbm [shape: f32[2,24,128], index: 3, kind: input, shape index: {}]   ;;  %s1592_s4 = inlined_call_operand.hbm [shape: f32[2,24,128], index: 4, kind: output, shape index: {}]  }
   0x1   :  { %1611 = sst [smem:[#allocation20_spill]] %s1589_s1 }
   0x2   :  { %1612 = sst [smem:[#allocation21_spill]] %s1590_s2 }
   0x3   :  { %9 = vsyncpa [#allocation5], 0 }
   0x4   :  { %10 = vsyncpa [#allocation3], 0 }
   0x5   :  { %12 = vsyncpa [#allocation3 + $0x1], 0 }
   0x6   :  { %13 = vsyncpa [#allocation8], 0 }
   0x7   :  { %15 = vsyncpa [#allocation8 + $0x1], 0 }
   0x8   :  { %16 = vsyncpa [#allocation4], 0 }
   0x9   :  { %18 = vsyncpa [#allocation4 + $0x1], 0  ;;  %s1042_s15 = smov 0   ;;  %s1044_s16 = smov 0  }
   0xa   :  { %s1046_s17 = smov 0   ;;  %s1048_s18 = smov 0  }
   0xb LB: > { %1613 = sst [smem:[#allocation15_spill]] %s992_s15  ;;  %s1063_s19 = sadd.s32 1, %s1004_s18   ;;  %s1004_s18 = sphi %s1048_s18, %s1643_s18   ;;  %s1000_s17 = sphi %s1046_s17, %s1645_s17   ;;  %s996_s16 = sphi %s1044_s16, %s1647_s16   ;;  %s992_s15 = sphi %s1042_s15, %s1646_s15  }
   0xc   : > { %1614 = sst [smem:[#allocation16_spill]] %s1000_s17  ;;  %s52_s20 = sadd.s32 1, %s1000_s17 }
   0xd   : > { %1615 = sst [smem:[#allocation17_spill]] %s1063_s19  ;;  %s49_s21 = ssub.s32 %s1004_s18, %s1063_s19 }
   0xe   : > { %p1593_p0 = scmp.ne.s32.totalorder %s1000_s17, %s996_s16  ;;  %p50_p1 = scmp.eq.s32.totalorder %s49_s21, 0 }
   0xf   : > { %p60_p2 = scmp.eq.s32.totalorder %s1004_s18, 0  ;;  %p785_p3 = scmp.lt.s32.totalorder %s1004_s18, 3 }
  0x10   : > { %s1073_s22 = scalar_select %p50_p1, %s1000_s17, %s52_s20  }
  0x11   : > { %p61_p4 = por %p60_p2, %p1593_p0  ;;  %s1079_s23 = sand.u32 1, %s1000_s17  }
  0x12   : > { %1616 = sst [smem:[#allocation18_spill]] %s1073_s22  ;;  %s1082_s24 = sshll.u32 %s1004_s18, 7 }
  0x13   : > { %p1084_p5 = pnand %p785_p3, %p61_p4  ;;  %s196_s26 = sand.u32 1, %s1004_s18  }
  0x14   : > { %s752_s27 = smul.u32 40, %s1079_s23  ;;  %s1618_s2 = sld [smem:[#allocation21_spill]] }
  0x15   : > { %s1097_s5 = sadd.s32 4294967295, %s1004_s18   ;;  %s673_s8 = sadd.s32 4294967294, %s1004_s18  }
  0x16   : > { %s200_s6 = scalar_lea.vmem [#allocation7], %s752_s27  ;;  %s1104_s9 = scalar_lea.sflag [#allocation8], %s196_s26 }
  0x17   : > { %s206_s7 = sshll.u32 %s200_s6, 4  ;;  %p1110_p8 = pneg %p1084_p5  ;;  %s1100_s7 = int_to_ptr.vmem [resolvable:$true] %s206_s7 }
  0x1a   : > { %s1094_s30 = scalar_lea.hbm %s1618_s2, %s1082_s24  ;;  %s832_s14 = scalar_lea.hbm %s1618_s2, 1920 }
  0x1b   : > { %s827_s10 = scalar_lea.hbm %s1094_s30, 640  ;;  %p833_p11 = scmp.lt.u32.totalorder %s1094_s30, %s1618_s2 }
  0x1c   : > { %p828_p7 = scmp.ne.s32.totalorder %s1094_s30, %s827_s10  ;;  %p834_p12 = scmp.lt.u32.totalorder %s832_s14, %s827_s10 }
  0x1d   : > { %p836_p1 = scmp.lt.u32.totalorder %s827_s10, %s1094_s30 }
  0x1e   : > { %p830_p9 = pnand %p1110_p8, %p828_p7  ;;  %p835_p13 = por %p834_p12, %p833_p11 }
  0x20   : > { %p831_p10 = pneg %p830_p9  ;;  %p837_p2 = por %p836_p1, %p835_p13 }
  0x22   : > { %p838_p3 = pnand %p837_p2, %p831_p10 }
  0x24   : > { %841 = shalt.err (!%p838_p3)
}
  0x25   : > { %s842_s26 = scalar_lea.vmem %s1100_s7, 640  ;;  %s1006_s27 = smov [#allocation7]  }
  0x26   : > { %p843_p4 = scmp.ne.s32.totalorder %s1100_s7, %s842_s26  ;;  %s847_s28 = sshll.u32 %s1006_s27, 4  ;;  %s848_s28 = int_to_ptr.vmem [resolvable:$false] %s847_s28 }
  0x27   : > { %s849_s29 = scalar_lea.vmem %s848_s28, 1280  ;;  %p850_p0 = scmp.lt.s32.totalorder %s1100_s7, %s848_s28 }
  0x28   : > { %p845_p7 = pnand %p843_p4, %p1110_p8  ;;  %p851_p6 = scmp.lt.s32.totalorder %s849_s29, %s842_s26 }
  0x2a   : > { %p846_p9 = pneg %p845_p7  ;;  %p852_p11 = por %p851_p6, %p850_p0 }
  0x2c   : > { %p853_p12 = pnand %p852_p11, %p846_p9 }
  0x2e   : > { %856 = shalt.err (!%p853_p12)
}
  0x2f   : > { %s1594_s6 = smov 384   ;;  %s1596_s10 = smov 128  }
  0x30   : > { %s1598_s12 = smov 8   ;;  %p1601_p0 = scmp.eq.s32.totalorder %s1097_s5, 0 }
  0x31   : > { %776 = dma.hbm_to_vmem [thread:$0]  (!%p1084_p5), %s1094_s30, 640, %s1100_s7, %s1104_s9, %s1594_s6, %s1596_s10, %s1598_s12  }
  0x32   : > { %p141_p6 = scmp.eq.s32.totalorder %s1097_s5, 2  ;;  %p147_p10 = scmp.eq.s32.totalorder %s673_s8, 2 }
  0x33   : > { %p674_p13 = scmp.ge.s32.totalorder %s1004_s18, 1  ;;  %p1620_p1 = scmp.ne.s32.totalorder %s996_s16, %s992_s15 }
  0x34   : > { %p1622_p3 = scmp.ne.s32.totalorder %s1000_s17, %s996_s16  ;;  %p154_p11 = scmp.lt.s32.totalorder %s1004_s18, 4 }
  0x35   : > { %p1147_p2 = por %p1601_p0, %p1620_p1  ;;  %p1624_p7 = pmov %p1620_p1 }
  0x36   : > { %p1154_p4 = por %p141_p6, %p1622_p3  ;;  %p1166_p12 = pnand %p674_p13, %p154_p11 }
  0x37   : > { %s1621_s13 = scalar_select %p1147_p2, 1, 0 }
  0x38   : > { %s1623_s14 = scalar_select %p1154_p4, 1, 0 }
  0x39   : > { %p1161_p9 = por %p147_p10, %p1624_p7  ;;  %s1600_s8 = sshll.u32 %s1079_s23, 4 }
  0x3a   : > { %s1627_s7 = scalar_select %p1166_p12, 1, 0 }
  0x3b   : > { %s1625_s30 = scalar_select %p1161_p9, 1, 0 }
  0x3c   : > { %s1628_s1 = sld [smem:[#allocation20_spill]]  ;;  %p766_p6 = pneg %p1166_p12 }
  0x3d   : > { %1626 = sst [smem:[#allocation19_spill]] %s1625_s30  ;;  %s180_s27 = scalar_lea.vmem [#allocation6], %s1600_s8 }
  0x3e   : > { %s186_s28 = sshll.u32 %s180_s27, 4  ;;  %p1183_p10 = pnand %p766_p6, %p1601_p0  ;;  %s1187_s28 = int_to_ptr.vmem [resolvable:$true] %s186_s28 }
  0x3f   : > { %s177_s6 = scalar_lea.sflag [#allocation3], %s1079_s23 }
  0x40   : > { %s1629_s29 = scalar_select %p1183_p10, 1, 0 }
  0x42   : > { %s1175_s26 = scalar_lea.hbm %s1628_s1, %s1082_s24  ;;  %s862_s12 = scalar_lea.hbm %s1628_s1, 768 }
  0x43   : > { %s857_s20 = scalar_lea.hbm %s1175_s26, 256  ;;  %p863_p7 = scmp.lt.u32.totalorder %s1175_s26, %s1628_s1 }
  0x44   : > { %p858_p13 = scmp.ne.s32.totalorder %s1175_s26, %s857_s20  ;;  %p864_p11 = scmp.lt.u32.totalorder %s862_s12, %s857_s20 }
  0x45   : > { %p866_p0 = scmp.lt.u32.totalorder %s857_s20, %s1175_s26 }
  0x46   : > { %p860_p1 = pnand %p858_p13, %p1110_p8  ;;  %p865_p6 = por %p864_p11, %p863_p7 }
  0x48   : > { %p861_p3 = pneg %p860_p1  ;;  %p867_p9 = por %p866_p0, %p865_p6 }
  0x4a   : > { %p868_p4 = pnand %p867_p9, %p861_p3 }
  0x4c   : > { %871 = shalt.err (!%p868_p4)
}
  0x4d   : > { %s872_s27 = scalar_lea.vmem %s1187_s28, 256  ;;  %s1010_s10 = smov [#allocation6]  }
  0x4e   : > { %p873_p13 = scmp.ne.s32.totalorder %s1187_s28, %s872_s27  ;;  %s877_s21 = sshll.u32 %s1010_s10, 4  ;;  %s878_s21 = int_to_ptr.vmem [resolvable:$false] %s877_s21 }
  0x4f   : > { %s879_s2 = scalar_lea.vmem %s878_s21, 512  ;;  %p880_p12 = scmp.lt.s32.totalorder %s1187_s28, %s878_s21 }
  0x50   : > { %p875_p1 = pnand %p873_p13, %p1110_p8  ;;  %p881_p10 = scmp.lt.s32.totalorder %s879_s2, %s872_s27 }
  0x52   : > { %p876_p2 = pneg %p875_p1  ;;  %p882_p7 = por %p881_p10, %p880_p12 }
  0x54   : > { %p883_p11 = pnand %p882_p7, %p876_p2 }
  0x56   : > { %886 = shalt.err (!%p883_p11)
}
  0x57   : > { %s1630_s12 = smov 8   ;;  %s1631_s8 = smov 128  }
  0x58   : > { %s1632_s20 = smov 384   ;;  %s1633_s10 = sshll.u32 %s1079_s23, 4 }
  0x59   : > { %773 = dma.hbm_to_vmem [thread:$0]  (!%p1084_p5), %s1175_s26, 256, %s1187_s28, %s177_s6, %s1632_s20, %s1631_s8, %s1630_s12  }
  0x5a   : > { %s220_s1 = scalar_lea.vmem [#allocation9], %s1633_s10  ;;  %s887_s2 = scalar_lea.hbm %s1588_s0, 16 }
  0x5b   : > { %s226_s22 = sshll.u32 %s220_s1, 4  ;;  %p888_p0 = scmp.ne.s32.totalorder %s1588_s0, %s887_s2  ;;  %s1234_s22 = int_to_ptr.vmem [resolvable:$true] %s226_s22 }
  0x5c   : > { %p1634_p2 = scmp.ne.s32.totalorder %s1629_s29, 0  ;;  %p894_p10 = scmp.lt.u32.totalorder %s887_s2, %s1588_s0 }
  0x5e   : > { %p889_p4 = pneg %p1634_p2 }
  0x60   : > { %p890_p9 = pnand %p889_p4, %p888_p0 }
  0x62   : > { %p891_p12 = pneg %p890_p9 }
  0x64   : > { %p896_p3 = pnand %p894_p10, %p891_p12 }
  0x66   : > { %899 = shalt.err (!%p896_p3)
}
  0x67   : > { %s1011_s23 = smov [#allocation2]   ;;  %s1240_s26 = scalar_lea.hbm %s1591_s3, %s1082_s24 }
  0x68   : > { %769 = dma.hbm_to_smem (!%p1634_p2), %s1588_s0, 16, %s1011_s23, [#allocation5]  }
  0x69   : > { %s900_s15 = scalar_lea.hbm %s1240_s26, 256  ;;  %s905_s29 = scalar_lea.hbm %s1591_s3, 768 }
  0x6a   : > { %p901_p6 = scmp.ne.s32.totalorder %s1240_s26, %s900_s15  ;;  %p906_p7 = scmp.lt.u32.totalorder %s1240_s26, %s1591_s3 }
  0x6b   : > { %p907_p11 = scmp.lt.u32.totalorder %s905_s29, %s900_s15  ;;  %p909_p2 = scmp.lt.u32.totalorder %s900_s15, %s1240_s26 }
  0x6c   : > { %p903_p13 = pnand %p901_p6, %p1110_p8 }
  0x6d   : > { %p908_p0 = por %p907_p11, %p906_p7 }
  0x6e   : > { %p904_p1 = pneg %p903_p13 }
  0x6f   : > { %p910_p4 = por %p909_p2, %p908_p0 }
  0x71   : > { %p911_p9 = pnand %p910_p4, %p904_p1 }
  0x73   : > { %914 = shalt.err (!%p911_p9)
}
  0x74   : > { %s915_s24 = scalar_lea.vmem %s1234_s22, 256  ;;  %s1012_s27 = smov [#allocation9]  }
  0x75   : > { %p916_p12 = scmp.ne.s32.totalorder %s1234_s22, %s915_s24  ;;  %s920_s2 = sshll.u32 %s1012_s27, 4  ;;  %s921_s2 = int_to_ptr.vmem [resolvable:$false] %s920_s2 }
  0x76   : > { %s922_s23 = scalar_lea.vmem %s921_s2, 512  ;;  %p923_p6 = scmp.lt.s32.totalorder %s1234_s22, %s921_s2 }
  0x77   : > { %p918_p10 = pnand %p916_p12, %p1110_p8  ;;  %p924_p13 = scmp.lt.s32.totalorder %s922_s23, %s915_s24 }
  0x79   : > { %p919_p3 = pneg %p918_p10  ;;  %p925_p7 = por %p924_p13, %p923_p6 }
  0x7b   : > { %p926_p11 = pnand %p925_p7, %p919_p3 }
  0x7d   : > { %929 = shalt.err (!%p926_p11)
}
  0x7e   : > { %779 = dma.hbm_to_vmem [thread:$0]  (!%p1084_p5), %s1240_s26, 256, %s1234_s22, %s1104_s9, %s1632_s20, %s1631_s8, %s1630_s12  }
  0x7f   : > { %p1635_p8 = scmp.ne.s32.totalorder %s1627_s7, 0 }
  0x80   : > { %p1636_p1 = scmp.eq.s32.totalorder (!%p1635_p8), %s1097_s5, 0 }
  0x81   : > { %238 = sbr.rel (%p1635_p8) target bundleno = 211 (0xd3), region = 36 }
  0x88   : > { %975 = dma.done.wait (%p1636_p1), [#allocation5], 16   ;;  %p1637_p0 = pmov %p1636_p1 }
  0x89   : > { %s1274_s11 = sand.u32 1, %s996_s16   ;;  %p1638_p5 = scmp.ne.s32.totalorder %s1621_s13, 0 }
  0x8a   : > { %977 = vsyncadd (%p1637_p0), [#allocation5], 4294967280  ;;  %s1277_s25 = sshll.u32 %s1274_s11, 4  ;;  %s245_s1 = scalar_lea.sflag [#allocation3], %s1274_s11 }
  0x8b   : > { %s248_s22 = scalar_lea.vmem [#allocation6], %s1277_s25 }
  0x8c   : > { %979 = dma.done.wait (%p1638_p5), %s245_s1, 256  }
  0x8d   : > { %981 = vsyncadd (%p1638_p5), %s245_s1, 4294967040  ;;  %s253_s9 = sand.u32 1, %s1097_s5   ;;  %s753_s7 = smul.u32 40, %s1274_s11 }
  0x8e   : > { %s254_s12 = scalar_lea.sflag [#allocation8], %s253_s9 }
  0x8f   : > { %s1287_s8 = scalar_lea.vmem [#allocation7], %s753_s7 }
  0x90   : > { %983 = dma.done.wait (%p1638_p5), %s254_s12, 896  }
  0x91   : > { %985 = vsyncadd (%p1638_p5), %s254_s12, 4294966400  ;;  %s266_s20 = scalar_lea.vmem [#allocation9], %s1277_s25 }
  0x92   : > { %271 = sfence }
  0x93   : > { %s689_s6 = sld [smem:[#allocation2 + $0x32]]  ;;  %v1294_v0 = vld [vmem:[%s248_s22] sm:$0xff]  ;;  %s314_s17 = sld [smem:[#allocation2]]  ;;  %v1300_v1 = vld [vmem:[%s248_s22 + $0x8] sm:$0xff]  ;;  %v1331_v9 = vld [vmem:[%s266_s20] sm:$0xff] }
  0x94   : > { %s690_s19 = sld [smem:[#allocation2 + $0xa]]  ;;  %s1296_s26 = sld [smem:[#allocation2 + $0x1]]  ;;  %v1306_v2 = vmul.f32 %v1294_v0, %v1294_v0  ;;  %v310_v3 = vld [vmem:[%s1287_s8] sm:$0xff]  ;;  %v1319_v4 = vmul.f32 %v1300_v1, %v1300_v1  ;;  %v699_v25 = vld [vmem:[%s1287_s8 + $0x8] sm:$0xff]  ;;  %v711_v53 = vld [vmem:[%s1287_s8 + $0x10] sm:$0xff] }
  0x95   : > { %s1298_s15 = sld [smem:[#allocation2 + $0xb]]  ;;  %s1302_s30 = sld [smem:[#allocation2 + $0x1e]]  ;;  %v1355_v20 = vld [vmem:[%s266_s20 + $0x8] sm:$0xff] }
  0x96   : > { %s694_s28 = sld [smem:[#allocation2 + $0x14]]  ;;  %s1309_s13 = sld [smem:[#allocation2 + $0x28]] }
  0x97   : > { %s1311_s29 = sld [smem:[#allocation2 + $0x1f]]  ;;  %s1313_s10 = sld [smem:[#allocation2 + $0x15]] }
  0x98   : > { %s1315_s21 = sld [smem:[#allocation2 + $0x29]]  ;;  %s1321_s24 = sld [smem:[#allocation2 + $0x33]] }
  0x99   : > { %v312_v5 = vstv %s689_s6  ;;  %s1323_s27 = sld [smem:[#allocation2 + $0x2]]  ;;  %v315_v7 = vstv %s314_s17  ;;  %s1325_s2 = sld [smem:[#allocation2 + $0xc]] }
  0x9a   : > { %v313_v6 = vadd.f32 %v312_v5, %v310_v3  ;;  %v319_v8 = vstv %s690_s19  ;;  %s1327_s23 = sld [smem:[#allocation2 + $0x3]]  ;;  %v316_v10 = vmul.f32 %v315_v7, %v1306_v2  ;;  %v323_v12 = vstv %s1296_s26  ;;  %s1337_s1 = sld [smem:[#allocation2 + $0xd]] }
  0x9b   : > { %v320_v11 = vmul.f32 %v319_v8, %v1294_v0  ;;  %v327_v13 = vstv %s1298_s15  ;;  %s1339_s22 = sld [smem:[#allocation2 + $0x20]]  ;;  %v334_v15 = vstv %s1302_s30  ;;  %s1342_s9 = sld [smem:[#allocation2 + $0x16]]  ;;  %v324_v17 = vmul.f32 %v323_v12, %v1319_v4 }
  0x9c   : > { %v332_v14 = vstv %s694_s28  ;;  %s1344_s7 = sld [smem:[#allocation2 + $0x2a]]  ;;  %v317_v16 = vadd.f32 %v316_v10, %v313_v6  ;;  %v337_v19 = vstv %s1309_s13  ;;  %s1349_s12 = sld [smem:[#allocation2 + $0x21]]  ;;  %v328_v21 = vmul.f32 %v1300_v1, %v327_v13 }
  0x9d   : > { %v333_v18 = vmul.f32 %v332_v14, %v1294_v0  ;;  %s1351_s6 = sld [smem:[#allocation2 + $0x17]]  ;;  %v338_v22 = vmul.f32 %v337_v19, %v1331_v9  ;;  %v342_v23 = vstv %s1313_s10  ;;  %s1362_s17 = sld [smem:[#allocation2 + $0x2b]]  ;;  %v344_v29 = vstv %s1311_s29 }
  0x9e   : > { %v347_v24 = vstv %s1315_s21  ;;  %s1364_s19 = sld [smem:[#allocation2 + $0x34]]  ;;  %v321_v26 = vadd.f32 %v320_v11, %v317_v16  ;;  %v343_v28 = vmul.f32 %v1300_v1, %v342_v23  ;;  %s1370_s26 = sld [smem:[#allocation2 + $0xe]]  ;;  %v353_v30 = vstv %s1321_s24  ;;  %v723_v23 = vld [vmem:[%s1287_s8 + $0x18] sm:$0xff] }
  0x9f   : > { %v335_v27 = vadd.f32 %v334_v15, %v333_v18  ;;  %s1368_s20 = sld [smem:[#allocation2 + $0x4]]  ;;  %v356_v31 = vstv %s1323_s27  ;;  %v360_v32 = vstv %s1325_s2  ;;  %s1376_s15 = sld [smem:[#allocation2 + $0x5]]  ;;  %v348_v35 = vmul.f32 %v1355_v20, %v347_v24 }
  0xa0   : > { %v364_v33 = vstv %s1327_s23  ;;  %v325_v34 = vadd.f32 %v324_v17, %v321_v26  ;;  %v354_v36 = vadd.f32 %v699_v25, %v353_v30  ;;  %s1379_s30 = sld [smem:[#allocation2 + $0xf]]  ;;  %v357_v38 = vmul.f32 %v356_v31, %v1306_v2  ;;  %s1386_s28 = sld [smem:[#allocation2 + $0x18]] }
  0xa1   : > { %v1381_v37 = vadd.f32 %v338_v22, %v335_v27  ;;  %v361_v39 = vmul.f32 %v360_v32, %v1294_v0  ;;  %v368_v40 = vstv %s1337_s1  ;;  %v345_v42 = vadd.f32 %v344_v29, %v343_v28  ;;  %s1392_s13 = sld [smem:[#allocation2 + $0x22]]  ;;  %s1394_s29 = sld [smem:[#allocation2 + $0x2c]] }
  0xa2   : > { %v1388_v41 = vadd.f32 %v328_v21, %v325_v34  ;;  %v365_v43 = vmul.f32 %v364_v33, %v1319_v4  ;;  %v375_v44 = vstv %s1342_s9  ;;  %v358_v45 = vadd.f32 %v357_v38, %v354_v36  ;;  %s1399_s10 = sld [smem:[#allocation2 + $0x19]]  ;;  %s1406_s21 = sld [smem:[#allocation2 + $0x23]] }
  0xa3   : > { %v376_v46 = vmul.f32 %v375_v44, %v1294_v0  ;;  %v377_v47 = vstv %s1339_s22  ;;  %v380_v48 = vstv %s1344_s7  ;;  %v369_v49 = vmul.f32 %v1300_v1, %v368_v40  ;;  %s1410_s24 = sld [smem:[#allocation2 + $0x2d]]  ;;  %s1418_s2 = sld [smem:[#allocation2 + $0x6]] }
  0xa4   : > { %v386_v50 = vstv %s1351_s6  ;;  %v388_v51 = vstv %s1349_s12  ;;  %v391_v52 = vstv %s1362_s17  ;;  %v362_v54 = vadd.f32 %v361_v39, %v358_v45  ;;  %s1412_s27 = sld [smem:[#allocation2 + $0x35]]  ;;  %s1421_s23 = sld [smem:[#allocation2 + $0x10]] }
  0xa5   : > { %v378_v55 = vadd.f32 %v377_v47, %v376_v46  ;;  %v381_v56 = vmul.f32 %v380_v48, %v1331_v9  ;;  %v387_v57 = vmul.f32 %v1300_v1, %v386_v50  ;;  %v398_v58 = vstv %s1364_s19  ;;  %s1426_s1 = sld [smem:[#allocation2 + $0x7]]  ;;  %s1428_s22 = sld [smem:[#allocation2 + $0x11]] }
  0xa6   : > { %v401_v59 = vstv %s1368_s20  ;;  %v405_v60 = vstv %s1370_s26  ;;  %v409_v61 = vstv %s1376_s15  ;;  %v366_v62 = vadd.f32 %v365_v43, %v362_v54  ;;  %s1435_s9 = sld [smem:[#allocation2 + $0x1a]]  ;;  %s1437_s7 = sld [smem:[#allocation2 + $0x2e]] }
  0xa7   : > { %v389_v63 = vadd.f32 %v388_v51, %v387_v57  ;;  %v392_v3 = vmul.f32 %v1355_v20, %v391_v52  ;;  %v399_v5 = vadd.f32 %v711_v53, %v398_v58  ;;  %v349_v6 = vadd.f32 %v348_v35, %v345_v42  ;;  %s1443_s12 = sld [smem:[#allocation2 + $0x24]]  ;;  %s1452_s6 = sld [smem:[#allocation2 + $0x25]] }
  0xa8   : > { %v402_v7 = vmul.f32 %v401_v59, %v1306_v2  ;;  %v406_v8 = vmul.f32 %v405_v60, %v1294_v0  ;;  %v413_v10 = vstv %s1379_s30  ;;  %v370_v11 = vadd.f32 %v369_v49, %v366_v62  ;;  %s1454_s17 = sld [smem:[#allocation2 + $0x1b]]  ;;  %s1459_s19 = sld [smem:[#allocation2 + $0x2f]] }
  0xa9   : > { %v382_v12 = vadd.f32 %v381_v56, %v378_v55  ;;  %v410_v13 = vmul.f32 %v409_v61, %v1319_v4  ;;  %v420_v14 = vstv %s1386_s28  ;;  %v422_v17 = vstv %s1392_s13  ;;  %s1461_s20 = sld [smem:[#allocation2 + $0x36]]  ;;  %s1465_s26 = sld [smem:[#allocation2 + $0x8]]  ;;  %v735_v55 = vld [vmem:[%s1287_s8 + $0x20] sm:$0xff] }
  0xaa   : > { %v403_v15 = vadd.f32 %v402_v7, %v399_v5  ;;  %v421_v16 = vmul.f32 %v420_v14, %v1294_v0  ;;  %v425_v18 = vstv %s1394_s29  ;;  %vm371_vm0 = vcmp.gt.f32.partialorder %v370_v11, %v1388_v41  ;;  %s1472_s15 = sld [smem:[#allocation2 + $0x12]]  ;;  %s1477_s30 = sld [smem:[#allocation2 + $0x9]] }
  0xab   : > { %v393_v19 = vadd.f32 %v392_v3, %v389_v63  ;;  %v414_v21 = vmul.f32 %v1300_v1, %v413_v10  ;;  %v431_v22 = vstv %s1399_s10  ;;  %v1448_v24 = vsel %vm371_vm0, %v370_v11, %v1388_v41  ;;  %s1479_s28 = sld [smem:[#allocation2 + $0x13]]  ;;  %s1487_s13 = sld [smem:[#allocation2 + $0x26]] }
  0xac   : > { %v407_v25 = vadd.f32 %v406_v8, %v403_v15  ;;  %v426_v26 = vmul.f32 %v425_v18, %v1331_v9  ;;  %v433_v27 = vstv %s1406_s21  ;;  %v423_v28 = vadd.f32 %v422_v17, %v421_v16  ;;  %s1489_s29 = sld [smem:[#allocation2 + $0x1c]]  ;;  %s1497_s10 = sld [smem:[#allocation2 + $0x30]] }
  0xad   : > { %v432_v29 = vmul.f32 %v1300_v1, %v431_v22  ;;  %v436_v30 = vstv %s1410_s24  ;;  %v443_v31 = vstv %s1412_s27  ;;  %v446_v35 = vstv %s1418_s2  ;;  %s1499_s21 = sld [smem:[#allocation2 + $0x27]]  ;;  %s1505_s24 = sld [smem:[#allocation2 + $0x1d]] }
  0xae   : > { %v411_v32 = vadd.f32 %v410_v13, %v407_v25  ;;  %v437_v33 = vmul.f32 %v1355_v20, %v436_v30  ;;  %v444_v34 = vadd.f32 %v723_v23, %v443_v31  ;;  %v383_v36 = vsel %vm371_vm0, %v382_v12, %v1381_v37  ;;  %s1507_s27 = sld [smem:[#allocation2 + $0x31]]  ;;  %s749_s8 = sshll.u32 %s1097_s5, 7 }
  0xaf   : > { %v434_v38 = vadd.f32 %v433_v27, %v432_v29  ;;  %v447_v39 = vmul.f32 %v446_v35, %v1306_v2  ;;  %v450_v40 = vstv %s1421_s23  ;;  %v454_v44 = vstv %s1426_s1  ;;  %s301_s2 = scalar_lea.vmem [#allocation10], %s1277_s25  ;;  %s533_s5 = scalar_lea.sflag [#allocation4], %s1274_s11 }
  0xb0   : > { %v415_v42 = vadd.f32 %v414_v21, %v411_v32  ;;  %v451_v43 = vmul.f32 %v450_v40, %v1294_v0  ;;  %v458_v45 = vstv %s1428_s22  ;;  %v394_v37 = vsel %vm371_vm0, %v393_v19, %v349_v6  ;;  %s545_s23 = sshll.u32 %s301_s2, 4  ;;  %p1639_p4 = scmp.ne.s32.totalorder %s1623_s14, 0  ;;  %s1545_s23 = int_to_ptr.vmem [resolvable:$true] %s545_s23 }
  0xb1   : > { %v427_v46 = vadd.f32 %v426_v26, %v423_v28  ;;  %v448_v47 = vadd.f32 %v447_v39, %v444_v34  ;;  %v455_v48 = vmul.f32 %v454_v44, %v1319_v4  ;;  %v438_v49 = vadd.f32 %v437_v33, %v434_v38  ;;  %s930_s25 = scalar_lea.vmem %s1545_s23, 256 }
  0xb2   : > { %vm416_vm1 = vcmp.gt.f32.partialorder %v415_v42, %v1448_v24  ;;  %v465_v50 = vstv %s1435_s9  ;;  %v470_v51 = vstv %s1437_s7  ;;  %v459_v53 = vmul.f32 %v1300_v1, %v458_v45  ;;  %s1543_s9 = scalar_lea.hbm %s1592_s4, %s749_s8  ;;  %p931_p2 = scmp.ne.s32.totalorder %s1545_s23, %s930_s25 }
  0xb3   : > { %v417_v41 = vsel %vm416_vm1, %v415_v42, %v1448_v24  ;;  %v452_v52 = vadd.f32 %v451_v43, %v448_v47  ;;  %v467_v54 = vstv %s1443_s12  ;;  %v466_v56 = vmul.f32 %v465_v50, %v1294_v0  ;;  %s1013_s7 = smov [#allocation10]  }
  0xb4   : > { %v471_v57 = vmul.f32 %v470_v51, %v1331_v9  ;;  %v476_v58 = vstv %s1454_s17  ;;  %v478_v59 = vstv %s1452_s6  ;;  %v481_v62 = vstv %s1459_s19  ;;  %p932_p9 = pnand %p931_p2, %p1639_p4  ;;  %s934_s12 = sshll.u32 %s1013_s7, 4  ;;  %s935_s12 = int_to_ptr.vmem [resolvable:$false] %s934_s12 }
  0xb5   : > { %v456_v60 = vadd.f32 %v455_v48, %v452_v52  ;;  %v477_v61 = vmul.f32 %v1300_v1, %v476_v58  ;;  %v488_v63 = vstv %s1461_s20  ;;  %v468_v3 = vadd.f32 %v467_v54, %v466_v56  ;;  %s936_s6 = scalar_lea.vmem %s935_s12, 512  ;;  %p937_p10 = scmp.lt.s32.totalorder %s1545_s23, %s935_s12 }
  0xb6   : > { %v482_v5 = vmul.f32 %v1355_v20, %v481_v62  ;;  %v489_v6 = vadd.f32 %v735_v55, %v488_v63  ;;  %v491_v7 = vstv %s1465_s26  ;;  %v495_v12 = vstv %s1472_s15  ;;  %p933_p12 = pneg %p932_p9  ;;  %p938_p3 = scmp.lt.s32.totalorder %s936_s6, %s930_s25 }
  0xb7   : > { %v460_v8 = vadd.f32 %v459_v53, %v456_v60  ;;  %v479_v10 = vadd.f32 %v478_v59, %v477_v61  ;;  %v492_v11 = vmul.f32 %v491_v7, %v1306_v2  ;;  %v496_v13 = vmul.f32 %v495_v12, %v1294_v0 }
  0xb8   : > { %v499_v14 = vstv %s1477_s30  ;;  %v503_v15 = vstv %s1479_s28  ;;  %v428_v16 = vsel %vm416_vm1, %v427_v46, %v383_v36  ;;  %v439_v17 = vsel %vm416_vm1, %v438_v49, %v394_v37  ;;  %p939_p6 = por %p938_p3, %p937_p10 }
  0xb9   : > { %v493_v18 = vadd.f32 %v492_v11, %v489_v6  ;;  %v500_v19 = vmul.f32 %v499_v14, %v1319_v4  ;;  %vm461_vm2 = vcmp.gt.f32.partialorder %v460_v8, %v417_v41  ;;  %v472_v2 = vadd.f32 %v471_v57, %v468_v3 }
  0xba   : > { %v483_v21 = vadd.f32 %v482_v5, %v479_v10  ;;  %v509_v22 = vstv %s1489_s29  ;;  %v504_v25 = vmul.f32 %v1300_v1, %v503_v15  ;;  %v511_v27 = vstv %s1487_s13  ;;  %p940_p13 = pnand %p939_p6, %p933_p12 }
  0xbb   : > { %v497_v23 = vadd.f32 %v496_v13, %v493_v18  ;;  %v510_v26 = vmul.f32 %v509_v22, %v1294_v0  ;;  %v514_v28 = vstv %s1497_s10  ;;  %v520_v29 = vstv %s1505_s24 }
  0xbc   : > { %v522_v30 = vstv %s1499_s21  ;;  %v525_v24 = vstv %s1507_s27  ;;  %v515_v4 = vmul.f32 %v514_v28, %v1331_v9  ;;  %v521_v33 = vmul.f32 %v1300_v1, %v520_v29 }
  0xbd   : > { %v501_v31 = vadd.f32 %v500_v19, %v497_v23  ;;  %v512_v32 = vadd.f32 %v511_v27, %v510_v26  ;;  %v462_v34 = vsel %vm461_vm2, %v460_v8, %v417_v41  ;;  %v526_v35 = vmul.f32 %v1355_v20, %v525_v24 }
  0xbe   : > { %v473_v0 = vsel %vm461_vm2, %v472_v2, %v428_v16  ;;  %v523_v39 = vadd.f32 %v522_v30, %v521_v33  ;;  %v484_v40 = vsel %vm461_vm2, %v483_v21, %v439_v17 }
  0xbf   : > { %v505_v36 = vadd.f32 %v504_v25, %v501_v31  ;;  %v516_v38 = vadd.f32 %v515_v4, %v512_v32 }
  0xc0   : > { %v527_v1 = vadd.f32 %v526_v35, %v523_v39 }
  0xc1   : > { %vm506_vm3 = vcmp.gt.f32.partialorder %v505_v36, %v462_v34 }
  0xc2   : > { %v517_v9 = vsel %vm506_vm3, %v516_v38, %v473_v0  ;;  %v528_v20 = vsel %vm506_vm3, %v527_v1, %v484_v40 }
  0xc3   : > { %529 = vst [vmem:[%s301_s2] sm:$0xff] %v517_v9  ;;  %747 = vst [vmem:[%s301_s2 + $0x8] sm:$0xff] %v528_v20 }
  0xc4   : > { %943 = shalt.err (!%p940_p13)
}
  0xc5   : > { %s944_s17 = scalar_lea.hbm %s1543_s9, 256  ;;  %s948_s26 = scalar_lea.hbm %s1592_s4, 768 }
  0xc6   : > { %p945_p7 = scmp.ne.s32.totalorder %s1543_s9, %s944_s17  ;;  %p949_p1 = scmp.lt.u32.totalorder %s1543_s9, %s1592_s4 }
  0xc7   : > { %p950_p0 = scmp.lt.u32.totalorder %s948_s26, %s944_s17  ;;  %p952_p2 = scmp.lt.u32.totalorder %s944_s17, %s1543_s9 }
  0xc8   : > { %p946_p11 = pnand %p945_p7, %p1639_p4 }
  0xc9   : > { %p951_p5 = por %p950_p0, %p949_p1 }
  0xca   : > { %p947_p8 = pneg %p946_p11 }
  0xcb   : > { %p953_p9 = por %p952_p2, %p951_p5 }
  0xcd   : > { %p954_p12 = pnand %p953_p9, %p947_p8 }
  0xcf   : > { %957 = shalt.err (!%p954_p12)
}
  0xd0   : > { %s1014_s28 = smov 128   ;;  %s1015_s13 = smov 384  }
  0xd1   : > { %s1016_s29 = smov 8  }
  0xd2   : > { %764 = dma.vmem_to_hbm [thread:$0]  (%p1639_p4), %s1545_s23, 256, %s1543_s9, %s533_s5, %s1014_s28, %s1015_s13, %s1016_s29  }
  0xd3 PF: > { %s1640_s10 = sld [smem:[#allocation15_spill]]  ;;  %s1641_s21 = sld [smem:[#allocation19_spill]] }
  0xd4   : > { %p787_p10 = scmp.ge.s32.totalorder %s1004_s18, 2 }
  0xd9   : > { %s560_s24 = sand.u32 1, %s1640_s10   ;;  %p1642_p3 = scmp.ne.s32.totalorder %s1641_s21, 0 }
  0xda   : > { %s561_s27 = scalar_lea.sflag [#allocation4], %s560_s24 }
  0xdb   : > { %p781_p6 = pnand %p787_p10, %p1642_p3 }
  0xdd   : > { %987 = dma.done.wait (!%p781_p6), %s561_s27, 256  }
  0xde   : > { %989 = vsyncadd (!%p781_p6), %s561_s27, 4294967040  ;;  %s1643_s18 = sld [smem:[#allocation17_spill]]  ;;  %s1644_s8 = sld [smem:[#allocation16_spill]] }
  0xdf   : > { %s1645_s17 = sld [smem:[#allocation18_spill]]  ;;  %s1646_s15 = smov %s996_s16 }
  0xe4   : > { %p21_p13 = scmp.ge.s32.totalorder %s1643_s18, 5   ;;  %s1647_s16 = smov %s1644_s8 }
  0xe6   :  { %23 = sbr.rel (!%p21_p13) target bundleno = 11 (0xb), region = 117 }
  0xed   :  { %566 = vsyncpa [#allocation3], 1 }
  0xee   :  { %568 = vsyncpa [#allocation3 + $0x1], 1 }
  0xef   :  { %569 = vsyncpa [#allocation8], 1 }
  0xf0   :  { %571 = vsyncpa [#allocation8 + $0x1], 1 }
  0xf1   :  { %572 = vsyncpa [#allocation4], 1 }
  0xf2   :  { %574 = vsyncpa [#allocation4 + $0x1], 1 }
  0xf3   :  { %575 = vsyncpa [#allocation5], 1 }
  0xf4   :  { %577 = vsyncpa [#allocation5 + $0x1], 1 }

</bundles_post_ra>
